<compile_context>
chip_gen: v7x
topology: tpu7x:2x2x1
jax: 0.10.0
libtpu: 0.0.40
codegen_flags: <defaults>
</compile_context>

<pallas_src>
import jax
import jax.numpy as jnp
from jax.experimental import pallas as pl
from jax.experimental.pallas import tpu as pltpu


def _round_up(n: int, m: int) -> int:
    return ((n + m - 1) // m) * m


def _make_mlp_kernel(n_linear: int):
    """Fused kernel for `n_linear` Linear layers (the last one is the output).

    Ref layout (positional):
      x_ref, (wT_0, b_0), ..., (wT_{L-1}, b_{L-1}), a_h, a_o, o_ref
    Hidden/output feature dims are zero-padded to multiples of 128; padded
    lanes stay exactly zero through every layer (zero weight rows/cols, zero
    bias, zero slope).  The raw input width is left unpadded.
    """

    def kernel(*refs):
        x_ref = refs[0]
        o_ref = refs[-1]
        a_h = refs[-3][...]          # [1, P_h]   shared hidden PReLU slope (f32)
        a_o = refs[-2][...]          # [1, P_out] output PReLU slope (f32)
        wb = refs[1:-3]              # interleaved (wT, b) per Linear layer

        h = x_ref[...]               # f32 activations, stay in vregs/VMEM
        # Hidden layers: y = h @ W^T + b ; h = PReLU_h(y).
        # bf16 only on the MXU operands; accumulate / bias / PReLU in f32.
        for i in range(n_linear - 1):
            w = wb[2 * i][...]                        # bf16 [K, P_h]
            b = wb[2 * i + 1][...]                    # f32  [1, P_h]
            y = jnp.dot(h.astype(w.dtype), w,
                        preferred_element_type=jnp.float32) + b
            h = jnp.where(y > 0, y, a_h * y)
        # Output layer + PReLU_o, lane-dense (multiple-of-128) store.
        w = wb[-2][...]
        b = wb[-1][...]
        y = jnp.dot(h.astype(w.dtype), w,
                    preferred_element_type=jnp.float32) + b
        o_ref[...] = jnp.where(y > 0, y, a_o * y).astype(o_ref.dtype)

    return kernel


class NeuralNetworkPallas:
    """JAX/Pallas port of the PyTorch NeuralNetwork MLP (forward pass)."""

    def __init__(self, input_size, output_size, hidden_size, n_hidden_layers=1,
                 key=jax.random.PRNGKey(0), batch_tile=512,
                 weight_dtype=jnp.bfloat16):
        self.input_size = input_size
        self.hidden_size = hidden_size
        self.output_size = output_size
        self.n_hidden_layers = n_hidden_layers
        self.batch_tile = batch_tile
        self.weight_dtype = weight_dtype
        self._use_buffered_consts = None     # resolved on first call (probe)

        # Lane-dense padded widths (multiples of 128) for everything past the
        # first matmul.  Input width is NOT padded (no wrapper pad copy).
        self.p_h = _round_up(hidden_size, 128)
        self.p_out = _round_up(output_size, 128)

        # ---- unpadded parameters in PyTorch layout (used by the reference) ----
        self.weights = []   # each [out, in]
        self.biases = []    # each [out]
        sizes_in = [input_size] + [hidden_size] * (n_hidden_layers - 1)
        for in_ in sizes_in:
            key, kw, kb = jax.random.split(key, 3)
            bound = 1.0 / (in_ ** 0.5)       # torch.nn.Linear default init range
            self.weights.append(
                jax.random.uniform(kw, (hidden_size, in_), jnp.float32, -bound, bound))
            self.biases.append(
                jax.random.uniform(kb, (hidden_size,), jnp.float32, -bound, bound))
        key, kw, kb = jax.random.split(key, 3)
        bound = 1.0 / (hidden_size ** 0.5)
        self.weights.append(
            jax.random.uniform(kw, (output_size, hidden_size), jnp.float32, -bound, bound))
        self.biases.append(
            jax.random.uniform(kb, (output_size,), jnp.float32, -bound, bound))

        # PReLU slopes (PyTorch default 0.25 per channel).  The spec model has
        # ONE nn.PReLU(hidden_size) shared by every hidden layer.
        self.a_h = jnp.full((hidden_size,), 0.25, jnp.float32)
        self.a_o = jnp.full((output_size,), 0.25, jnp.float32)

        # ---- kernel-side parameters: pre-transposed, zero-padded, bf16 ----
        def pad_wT(w, pi, po):
            o, i = w.shape
            return (jnp.zeros((pi, po), jnp.float32)
                    .at[:i, :o].set(w.T).astype(self.weight_dtype))

        def pad_row(v, p):
            return jnp.zeros((1, p), jnp.float32).at[0, :v.shape[0]].set(v)

        self.pad_dims = ([(input_size, self.p_h)]
                         + [(self.p_h, self.p_h)] * (n_hidden_layers - 1)
                         + [(self.p_h, self.p_out)])
        self.wT_pad = [pad_wT(w, pi, po)
                       for w, (pi, po) in zip(self.weights, self.pad_dims)]
        self.b_pad = [pad_row(b, po) for b, (_, po) in zip(self.biases, self.pad_dims)]
        self.a_h_pad = pad_row(self.a_h, self.p_h)
        self.a_o_pad = pad_row(self.a_o, self.p_out)

    # ------------------------------------------------------------- forward
    def __call__(self, x):
        B = x.shape[0]
        n_linear = self.n_hidden_layers + 1
        if x.dtype != jnp.float32:
            x = x.astype(jnp.float32)

        # Batch tile: multiple of 8 (f32 sublane); >= 2 tiles whenever possible
        # (keeps both v7x TensorCores busy); tm derived from ceil(B / n_tiles)
        # so last-tile padding waste stays bounded.
        n_tiles = max(pl.cdiv(B, self.batch_tile), 1)
        if B >= 16:
            n_tiles = max(n_tiles, 2)
        tm = _round_up(pl.cdiv(B, n_tiles), 8)
        b_pad = _round_up(B, tm)
        grid = b_pad // tm

        # Pad the batch dim only (no lane-padding copy of x).
        x_in = x if b_pad == B else jnp.pad(x, ((0, b_pad - B), (0, 0)))

        args = [x_in]
        for wT, b in zip(self.wT_pad, self.b_pad):
            args.extend([wT, b])
        args.extend([self.a_h_pad, self.a_o_pad])

        # VMEM budget: double-buffered x/out tiles + resident weights (worst
        # case 2x if single-buffering unsupported) + f32 intermediate headroom.
        wbytes = sum(int(w.size) * w.dtype.itemsize for w in self.wT_pad)
        cbytes = sum(int(b.size) * 4 for b in self.b_pad) + 4 * (self.p_h + self.p_out)
        io_bytes = 2 * tm * self.input_size * 4 + 2 * tm * self.p_out * 4
        act_bytes = 4 * tm * max(self.p_h, self.p_out) * 4
        est = 2 * (wbytes + cbytes) + io_bytes + act_bytes
        vmem_limit = min(48 << 20, max(32 << 20, int(1.5 * est) + (2 << 20)))

        flops = 2 * b_pad * sum(pi * po for pi, po in self.pad_dims)
        bytes_accessed = (b_pad * self.input_size * 4 + wbytes + cbytes
                          + b_pad * self.p_out * 4)
        cost = pl.CostEstimate(flops=flops, transcendentals=0,
                               bytes_accessed=bytes_accessed)

        def make_in_specs(use_buffered):
            def const(shape):
                if use_buffered:
                    # Grid-invariant operand: single-buffer it (index_map is
                    # always (0,0), double-buffering only doubles VMEM).
                    return pl.BlockSpec(shape, lambda i: (0, 0),
                                        pipeline_mode=pl.Buffered(1))
                return pl.BlockSpec(shape, lambda i: (0, 0))
            specs = [pl.BlockSpec((tm, self.input_size), lambda i: (i, 0))]
            for wT, b in zip(self.wT_pad, self.b_pad):
                specs.append(const(wT.shape))
                specs.append(const(b.shape))
            specs.append(const(self.a_h_pad.shape))
            specs.append(const(self.a_o_pad.shape))
            return specs

        def run(use_buffered):
            return pl.pallas_call(
                _make_mlp_kernel(n_linear),
                out_shape=jax.ShapeDtypeStruct((b_pad, self.p_out), jnp.float32),
                grid=(grid,),
                in_specs=make_in_specs(use_buffered),
                out_specs=pl.BlockSpec((tm, self.p_out), lambda i: (i, 0)),
                compiler_params=pltpu.CompilerParams(
                    dimension_semantics=("parallel",),
                    vmem_limit_bytes=vmem_limit),
                cost_estimate=cost,
            )(*args)

        if self._use_buffered_consts is None:
            try:
                out_p = jax.block_until_ready(run(True))
                self._use_buffered_consts = True
            except Exception:
                # Older JAX / Mosaic without pipeline_mode support: plain specs.
                out_p = run(False)
                self._use_buffered_consts = False
        else:
            out_p = run(self._use_buffered_consts)

        if b_pad == B and self.p_out == self.output_size:
            return out_p
        return out_p[:B, :self.output_size]


def _reference(model, x):
    """Pure-JAX reference with the same numerics (bf16 matmul, f32 epilogue)."""
    wd = model.weight_dtype

    def prelu(y, a):
        return jnp.where(y > 0, y, a * y)

    h = x.astype(jnp.float32)
    for w, b in zip(model.weights[:-1], model.biases[:-1]):
        y = jnp.dot(h.astype(wd), w.T.astype(wd),
                    preferred_element_type=jnp.float32) + b
        h = prelu(y, model.a_h)
    y = jnp.dot(h.astype(wd), model.weights[-1].T.astype(wd),
                preferred_element_type=jnp.float32) + model.biases[-1]
    return prelu(y, model.a_o)


if __name__ == "__main__":
    key = jax.random.PRNGKey(0)
    kx, kx2, kp = jax.random.split(key, 3)

    batch, input_size, hidden_size, output_size = 8, 16, 32, 8
    n_hidden_layers = 2

    model = NeuralNetworkPallas(input_size, output_size, hidden_size,
                                n_hidden_layers=n_hidden_layers, key=kp)

    # Case 1: tiny batch (single tile).
    x = jax.random.normal(kx, (batch, input_size), jnp.float32)
    out = jax.block_until_ready(model(x))
    ref = _reference(model, x)
    assert out.shape == (batch, output_size)
    assert jnp.allclose(out, ref, atol=1e-3, rtol=1e-3), "mismatch vs JAX reference (case 1)"

    # Case 2: non-tile-aligned batch -> exercises batch padding and a 2-tile grid.
    x2 = jax.random.normal(kx2, (20, input_size), jnp.float32)
    out2 = jax.block_until_ready(model(x2))
    ref2 = _reference(model, x2)
    assert out2.shape == (20, output_size)
    assert jnp.allclose(out2, ref2, atol=1e-3, rtol=1e-3), "mismatch vs JAX reference (case 2)"

    print("KERNEL_OK")
</pallas_src>

<mosaic_0001>
module attributes {stable_mosaic.version = 11 : i64} {
  func.func @kernel(%arg0: i32, %arg1: memref<8x16xf32, #tpu.memory_space<vmem>>, %arg2: memref<16x128xbf16, #tpu.memory_space<vmem>>, %arg3: memref<1x128xf32, #tpu.memory_space<vmem>>, %arg4: memref<128x128xbf16, #tpu.memory_space<vmem>>, %arg5: memref<1x128xf32, #tpu.memory_space<vmem>>, %arg6: memref<128x128xbf16, #tpu.memory_space<vmem>>, %arg7: memref<1x128xf32, #tpu.memory_space<vmem>>, %arg8: memref<1x128xf32, #tpu.memory_space<vmem>>, %arg9: memref<1x128xf32, #tpu.memory_space<vmem>>, %arg10: memref<8x128xf32, #tpu.memory_space<vmem>>) attributes {dimension_semantics = [#tpu.dimension_semantics<parallel>], iteration_bounds = array<i64: 1>, scalar_prefetch = 0 : i64, scratch_operands = 0 : i64, tpu.core_type = #tpu.core_type<tc>, window_params = [{transform_indices = @transform_0, window_bounds = array<i64: 8, 16>}, {pipeline_mode = #tpu.pipeline_mode<synchronous>, transform_indices = @transform_1, window_bounds = array<i64: 16, 128>}, {pipeline_mode = #tpu.pipeline_mode<synchronous>, transform_indices = @transform_2, window_bounds = array<i64: 1, 128>}, {pipeline_mode = #tpu.pipeline_mode<synchronous>, transform_indices = @transform_3, window_bounds = array<i64: 128, 128>}, {pipeline_mode = #tpu.pipeline_mode<synchronous>, transform_indices = @transform_4, window_bounds = array<i64: 1, 128>}, {pipeline_mode = #tpu.pipeline_mode<synchronous>, transform_indices = @transform_5, window_bounds = array<i64: 128, 128>}, {pipeline_mode = #tpu.pipeline_mode<synchronous>, transform_indices = @transform_6, window_bounds = array<i64: 1, 128>}, {pipeline_mode = #tpu.pipeline_mode<synchronous>, transform_indices = @transform_7, window_bounds = array<i64: 1, 128>}, {pipeline_mode = #tpu.pipeline_mode<synchronous>, transform_indices = @transform_8, window_bounds = array<i64: 1, 128>}, {transform_indices = @transform_9, window_bounds = array<i64: 8, 128>}]} {
    %c0 = arith.constant 0 : index
    %c0_0 = arith.constant 0 : index
    %0 = vector.load %arg8[%c0, %c0_0] : memref<1x128xf32, #tpu.memory_space<vmem>>, vector<1x128xf32>
    %c0_1 = arith.constant 0 : index
    %c0_2 = arith.constant 0 : index
    %1 = vector.load %arg9[%c0_1, %c0_2] : memref<1x128xf32, #tpu.memory_space<vmem>>, vector<1x128xf32>
    %c0_3 = arith.constant 0 : index
    %c0_4 = arith.constant 0 : index
    %2 = vector.load %arg1[%c0_3, %c0_4] : memref<8x16xf32, #tpu.memory_space<vmem>>, vector<8x16xf32>
    %c0_5 = arith.constant 0 : index
    %c0_6 = arith.constant 0 : index
    %3 = vector.load %arg2[%c0_5, %c0_6] : memref<16x128xbf16, #tpu.memory_space<vmem>>, vector<16x128xbf16>
    %c0_7 = arith.constant 0 : index
    %c0_8 = arith.constant 0 : index
    %4 = vector.load %arg3[%c0_7, %c0_8] : memref<1x128xf32, #tpu.memory_space<vmem>>, vector<1x128xf32>
    %5 = arith.truncf %2 : vector<8x16xf32> to vector<8x16xbf16>
    %cst = arith.constant dense<0.000000e+00> : vector<8x128xf32>
    %6 = tpu.matmul %5, %3, %cst {dimension_numbers = #tpu.dot_dimension_numbers<[1], [0], [0], [1], [0, 0, 1, 1], [], []>} : vector<8x16xbf16>, vector<16x128xbf16>, vector<8x128xf32> -> vector<8x128xf32>
    %7 = vector.broadcast %4 : vector<1x128xf32> to vector<8x128xf32>
    %8 = arith.addf %6, %7 : vector<8x128xf32>
    %cst_9 = arith.constant 0.000000e+00 : f32
    %9 = vector.broadcast %cst_9 : f32 to vector<8x128xf32>
    %10 = arith.cmpf ogt, %8, %9 : vector<8x128xf32>
    %11 = vector.broadcast %0 : vector<1x128xf32> to vector<8x128xf32>
    %12 = arith.mulf %11, %8 : vector<8x128xf32>
    %13 = arith.select %10, %8, %12 : vector<8x128xi1>, vector<8x128xf32>
    %c0_10 = arith.constant 0 : index
    %c0_11 = arith.constant 0 : index
    %14 = vector.load %arg4[%c0_10, %c0_11] : memref<128x128xbf16, #tpu.memory_space<vmem>>, vector<128x128xbf16>
    %c0_12 = arith.constant 0 : index
    %c0_13 = arith.constant 0 : index
    %15 = vector.load %arg5[%c0_12, %c0_13] : memref<1x128xf32, #tpu.memory_space<vmem>>, vector<1x128xf32>
    %16 = arith.truncf %13 : vector<8x128xf32> to vector<8x128xbf16>
    %cst_14 = arith.constant dense<0.000000e+00> : vector<8x128xf32>
    %17 = tpu.matmul %16, %14, %cst_14 {dimension_numbers = #tpu.dot_dimension_numbers<[1], [0], [0], [1], [0, 0, 1, 1], [], []>} : vector<8x128xbf16>, vector<128x128xbf16>, vector<8x128xf32> -> vector<8x128xf32>
    %18 = vector.broadcast %15 : vector<1x128xf32> to vector<8x128xf32>
    %19 = arith.addf %17, %18 : vector<8x128xf32>
    %cst_15 = arith.constant 0.000000e+00 : f32
    %20 = vector.broadcast %cst_15 : f32 to vector<8x128xf32>
    %21 = arith.cmpf ogt, %19, %20 : vector<8x128xf32>
    %22 = vector.broadcast %0 : vector<1x128xf32> to vector<8x128xf32>
    %23 = arith.mulf %22, %19 : vector<8x128xf32>
    %24 = arith.select %21, %19, %23 : vector<8x128xi1>, vector<8x128xf32>
    %c0_16 = arith.constant 0 : index
    %c0_17 = arith.constant 0 : index
    %25 = vector.load %arg6[%c0_16, %c0_17] : memref<128x128xbf16, #tpu.memory_space<vmem>>, vector<128x128xbf16>
    %c0_18 = arith.constant 0 : index
    %c0_19 = arith.constant 0 : index
    %26 = vector.load %arg7[%c0_18, %c0_19] : memref<1x128xf32, #tpu.memory_space<vmem>>, vector<1x128xf32>
    %27 = arith.truncf %24 : vector<8x128xf32> to vector<8x128xbf16>
    %cst_20 = arith.constant dense<0.000000e+00> : vector<8x128xf32>
    %28 = tpu.matmul %27, %25, %cst_20 {dimension_numbers = #tpu.dot_dimension_numbers<[1], [0], [0], [1], [0, 0, 1, 1], [], []>} : vector<8x128xbf16>, vector<128x128xbf16>, vector<8x128xf32> -> vector<8x128xf32>
    %29 = vector.broadcast %26 : vector<1x128xf32> to vector<8x128xf32>
    %30 = arith.addf %28, %29 : vector<8x128xf32>
    %cst_21 = arith.constant 0.000000e+00 : f32
    %31 = vector.broadcast %cst_21 : f32 to vector<8x128xf32>
    %32 = arith.cmpf ogt, %30, %31 : vector<8x128xf32>
    %33 = vector.broadcast %1 : vector<1x128xf32> to vector<8x128xf32>
    %34 = arith.mulf %33, %30 : vector<8x128xf32>
    %35 = arith.select %32, %30, %34 : vector<8x128xi1>, vector<8x128xf32>
    %c0_22 = arith.constant 0 : index
    %c0_23 = arith.constant 0 : index
    %36 = vector.load %arg10[%c0_22, %c0_23] : memref<8x128xf32, #tpu.memory_space<vmem>>, vector<8x128xf32>
    tpu.vector_store %arg10[%c0_22, %c0_23], %35 {strides = array<i32>} : memref<8x128xf32, #tpu.memory_space<vmem>>, vector<8x128xf32>,
    return
  }
  func.func @transform_0(%arg0: i32) -> (i32, i32) {
    %c0_i32 = arith.constant 0 : i32
    %c0_i32_0 = arith.constant 0 : i32
    return %arg0, %c0_i32 : i32, i32
  }
  func.func @transform_1(%arg0: i32) -> (i32, i32) {
    %c0_i32 = arith.constant 0 : i32
    %c0_i32_0 = arith.constant 0 : i32
    %c0_i32_1 = arith.constant 0 : i32
    return %c0_i32, %c0_i32_0 : i32, i32
  }
  func.func @transform_2(%arg0: i32) -> (i32, i32) {
    %c0_i32 = arith.constant 0 : i32
    %c0_i32_0 = arith.constant 0 : i32
    %c0_i32_1 = arith.constant 0 : i32
    return %c0_i32, %c0_i32_0 : i32, i32
  }
  func.func @transform_3(%arg0: i32) -> (i32, i32) {
    %c0_i32 = arith.constant 0 : i32
    %c0_i32_0 = arith.constant 0 : i32
    %c0_i32_1 = arith.constant 0 : i32
    return %c0_i32, %c0_i32_0 : i32, i32
  }
  func.func @transform_4(%arg0: i32) -> (i32, i32) {
    %c0_i32 = arith.constant 0 : i32
    %c0_i32_0 = arith.constant 0 : i32
    %c0_i32_1 = arith.constant 0 : i32
    return %c0_i32, %c0_i32_0 : i32, i32
  }
  func.func @transform_5(%arg0: i32) -> (i32, i32) {
    %c0_i32 = arith.constant 0 : i32
    %c0_i32_0 = arith.constant 0 : i32
    %c0_i32_1 = arith.constant 0 : i32
    return %c0_i32, %c0_i32_0 : i32, i32
  }
  func.func @transform_6(%arg0: i32) -> (i32, i32) {
    %c0_i32 = arith.constant 0 : i32
    %c0_i32_0 = arith.constant 0 : i32
    %c0_i32_1 = arith.constant 0 : i32
    return %c0_i32, %c0_i32_0 : i32, i32
  }
  func.func @transform_7(%arg0: i32) -> (i32, i32) {
    %c0_i32 = arith.constant 0 : i32
    %c0_i32_0 = arith.constant 0 : i32
    %c0_i32_1 = arith.constant 0 : i32
    return %c0_i32, %c0_i32_0 : i32, i32
  }
  func.func @transform_8(%arg0: i32) -> (i32, i32) {
    %c0_i32 = arith.constant 0 : i32
    %c0_i32_0 = arith.constant 0 : i32
    %c0_i32_1 = arith.constant 0 : i32
    return %c0_i32, %c0_i32_0 : i32, i32
  }
  func.func @transform_9(%arg0: i32) -> (i32, i32) {
    %c0_i32 = arith.constant 0 : i32
    %c0_i32_0 = arith.constant 0 : i32
    return %arg0, %c0_i32 : i32, i32
  }
}

module attributes {stable_mosaic.version = 11 : i64} {
  func.func @kernel(%arg0: i32, %arg1: memref<8x16xf32, #tpu.memory_space<vmem>>, %arg2: memref<16x128xbf16, #tpu.memory_space<vmem>>, %arg3: memref<1x128xf32, #tpu.memory_space<vmem>>, %arg4: memref<128x128xbf16, #tpu.memory_space<vmem>>, %arg5: memref<1x128xf32, #tpu.memory_space<vmem>>, %arg6: memref<128x128xbf16, #tpu.memory_space<vmem>>, %arg7: memref<1x128xf32, #tpu.memory_space<vmem>>, %arg8: memref<1x128xf32, #tpu.memory_space<vmem>>, %arg9: memref<1x128xf32, #tpu.memory_space<vmem>>, %arg10: memref<8x128xf32, #tpu.memory_space<vmem>>) attributes {dimension_semantics = [#tpu.dimension_semantics<parallel>], iteration_bounds = array<i64: 1>, scalar_prefetch = 0 : i64, scratch_operands = 0 : i64, tpu.core_type = #tpu.core_type<tc>, window_params = [{transform_indices = @transform_0, window_bounds = array<i64: 8, 16>}, {pipeline_mode = #tpu.pipeline_mode<synchronous>, transform_indices = @transform_1, window_bounds = array<i64: 16, 128>}, {pipeline_mode = #tpu.pipeline_mode<synchronous>, transform_indices = @transform_2, window_bounds = array<i64: 1, 128>}, {pipeline_mode = #tpu.pipeline_mode<synchronous>, transform_indices = @transform_3, window_bounds = array<i64: 128, 128>}, {pipeline_mode = #tpu.pipeline_mode<synchronous>, transform_indices = @transform_4, window_bounds = array<i64: 1, 128>}, {pipeline_mode = #tpu.pipeline_mode<synchronous>, transform_indices = @transform_5, window_bounds = array<i64: 128, 128>}, {pipeline_mode = #tpu.pipeline_mode<synchronous>, transform_indices = @transform_6, window_bounds = array<i64: 1, 128>}, {pipeline_mode = #tpu.pipeline_mode<synchronous>, transform_indices = @transform_7, window_bounds = array<i64: 1, 128>}, {pipeline_mode = #tpu.pipeline_mode<synchronous>, transform_indices = @transform_8, window_bounds = array<i64: 1, 128>}, {transform_indices = @transform_9, window_bounds = array<i64: 8, 128>}]} {
    %c0 = arith.constant 0 : index
    %c0_0 = arith.constant 0 : index
    %0 = vector.load %arg8[%c0, %c0_0] : memref<1x128xf32, #tpu.memory_space<vmem>>, vector<1x128xf32>
    %c0_1 = arith.constant 0 : index
    %c0_2 = arith.constant 0 : index
    %1 = vector.load %arg9[%c0_1, %c0_2] : memref<1x128xf32, #tpu.memory_space<vmem>>, vector<1x128xf32>
    %c0_3 = arith.constant 0 : index
    %c0_4 = arith.constant 0 : index
    %2 = vector.load %arg1[%c0_3, %c0_4] : memref<8x16xf32, #tpu.memory_space<vmem>>, vector<8x16xf32>
    %c0_5 = arith.constant 0 : index
    %c0_6 = arith.constant 0 : index
    %3 = vector.load %arg2[%c0_5, %c0_6] : memref<16x128xbf16, #tpu.memory_space<vmem>>, vector<16x128xbf16>
    %c0_7 = arith.constant 0 : index
    %c0_8 = arith.constant 0 : index
    %4 = vector.load %arg3[%c0_7, %c0_8] : memref<1x128xf32, #tpu.memory_space<vmem>>, vector<1x128xf32>
    %5 = arith.truncf %2 : vector<8x16xf32> to vector<8x16xbf16>
    %cst = arith.constant dense<0.000000e+00> : vector<8x128xf32>
    %6 = tpu.matmul %5, %3, %cst {dimension_numbers = #tpu.dot_dimension_numbers<[1], [0], [0], [1], [0, 0, 1, 1], [], []>} : vector<8x16xbf16>, vector<16x128xbf16>, vector<8x128xf32> -> vector<8x128xf32>
    %7 = vector.broadcast %4 : vector<1x128xf32> to vector<8x128xf32>
    %8 = arith.addf %6, %7 : vector<8x128xf32>
    %cst_9 = arith.constant 0.000000e+00 : f32
    %9 = vector.broadcast %cst_9 : f32 to vector<8x128xf32>
    %10 = arith.cmpf ogt, %8, %9 : vector<8x128xf32>
    %11 = vector.broadcast %0 : vector<1x128xf32> to vector<8x128xf32>
    %12 = arith.mulf %11, %8 : vector<8x128xf32>
    %13 = arith.select %10, %8, %12 : vector<8x128xi1>, vector<8x128xf32>
    %c0_10 = arith.constant 0 : index
    %c0_11 = arith.constant 0 : index
    %14 = vector.load %arg4[%c0_10, %c0_11] : memref<128x128xbf16, #tpu.memory_space<vmem>>, vector<128x128xbf16>
    %c0_12 = arith.constant 0 : index
    %c0_13 = arith.constant 0 : index
    %15 = vector.load %arg5[%c0_12, %c0_13] : memref<1x128xf32, #tpu.memory_space<vmem>>, vector<1x128xf32>
    %16 = arith.truncf %13 : vector<8x128xf32> to vector<8x128xbf16>
    %cst_14 = arith.constant dense<0.000000e+00> : vector<8x128xf32>
    %17 = tpu.matmul %16, %14, %cst_14 {dimension_numbers = #tpu.dot_dimension_numbers<[1], [0], [0], [1], [0, 0, 1, 1], [], []>} : vector<8x128xbf16>, vector<128x128xbf16>, vector<8x128xf32> -> vector<8x128xf32>
    %18 = vector.broadcast %15 : vector<1x128xf32> to vector<8x128xf32>
    %19 = arith.addf %17, %18 : vector<8x128xf32>
    %cst_15 = arith.constant 0.000000e+00 : f32
    %20 = vector.broadcast %cst_15 : f32 to vector<8x128xf32>
    %21 = arith.cmpf ogt, %19, %20 : vector<8x128xf32>
    %22 = vector.broadcast %0 : vector<1x128xf32> to vector<8x128xf32>
    %23 = arith.mulf %22, %19 : vector<8x128xf32>
    %24 = arith.select %21, %19, %23 : vector<8x128xi1>, vector<8x128xf32>
    %c0_16 = arith.constant 0 : index
    %c0_17 = arith.constant 0 : index
    %25 = vector.load %arg6[%c0_16, %c0_17] : memref<128x128xbf16, #tpu.memory_space<vmem>>, vector<128x128xbf16>
    %c0_18 = arith.constant 0 : index
    %c0_19 = arith.constant 0 : index
    %26 = vector.load %arg7[%c0_18, %c0_19] : memref<1x128xf32, #tpu.memory_space<vmem>>, vector<1x128xf32>
    %27 = arith.truncf %24 : vector<8x128xf32> to vector<8x128xbf16>
    %cst_20 = arith.constant dense<0.000000e+00> : vector<8x128xf32>
    %28 = tpu.matmul %27, %25, %cst_20 {dimension_numbers = #tpu.dot_dimension_numbers<[1], [0], [0], [1], [0, 0, 1, 1], [], []>} : vector<8x128xbf16>, vector<128x128xbf16>, vector<8x128xf32> -> vector<8x128xf32>
    %29 = vector.broadcast %26 : vector<1x128xf32> to vector<8x128xf32>
    %30 = arith.addf %28, %29 : vector<8x128xf32>
    %cst_21 = arith.constant 0.000000e+00 : f32
    %31 = vector.broadcast %cst_21 : f32 to vector<8x128xf32>
    %32 = arith.cmpf ogt, %30, %31 : vector<8x128xf32>
    %33 = vector.broadcast %1 : vector<1x128xf32> to vector<8x128xf32>
    %34 = arith.mulf %33, %30 : vector<8x128xf32>
    %35 = arith.select %32, %30, %34 : vector<8x128xi1>, vector<8x128xf32>
    %c0_22 = arith.constant 0 : index
    %c0_23 = arith.constant 0 : index
    %36 = vector.load %arg10[%c0_22, %c0_23] : memref<8x128xf32, #tpu.memory_space<vmem>>, vector<8x128xf32>
    tpu.vector_store %arg10[%c0_22, %c0_23], %35 {strides = array<i32>} : memref<8x128xf32, #tpu.memory_space<vmem>>, vector<8x128xf32>,
    return
  }
  func.func @transform_0(%arg0: i32) -> (i32, i32) {
    %c0_i32 = arith.constant 0 : i32
    %c0_i32_0 = arith.constant 0 : i32
    return %arg0, %c0_i32 : i32, i32
  }
  func.func @transform_1(%arg0: i32) -> (i32, i32) {
    %c0_i32 = arith.constant 0 : i32
    %c0_i32_0 = arith.constant 0 : i32
    %c0_i32_1 = arith.constant 0 : i32
    return %c0_i32, %c0_i32_0 : i32, i32
  }
  func.func @transform_2(%arg0: i32) -> (i32, i32) {
    %c0_i32 = arith.constant 0 : i32
    %c0_i32_0 = arith.constant 0 : i32
    %c0_i32_1 = arith.constant 0 : i32
    return %c0_i32, %c0_i32_0 : i32, i32
  }
  func.func @transform_3(%arg0: i32) -> (i32, i32) {
    %c0_i32 = arith.constant 0 : i32
    %c0_i32_0 = arith.constant 0 : i32
    %c0_i32_1 = arith.constant 0 : i32
    return %c0_i32, %c0_i32_0 : i32, i32
  }
  func.func @transform_4(%arg0: i32) -> (i32, i32) {
    %c0_i32 = arith.constant 0 : i32
    %c0_i32_0 = arith.constant 0 : i32
    %c0_i32_1 = arith.constant 0 : i32
    return %c0_i32, %c0_i32_0 : i32, i32
  }
  func.func @transform_5(%arg0: i32) -> (i32, i32) {
    %c0_i32 = arith.constant 0 : i32
    %c0_i32_0 = arith.constant 0 : i32
    %c0_i32_1 = arith.constant 0 : i32
    return %c0_i32, %c0_i32_0 : i32, i32
  }
  func.func @transform_6(%arg0: i32) -> (i32, i32) {
    %c0_i32 = arith.constant 0 : i32
    %c0_i32_0 = arith.constant 0 : i32
    %c0_i32_1 = arith.constant 0 : i32
    return %c0_i32, %c0_i32_0 : i32, i32
  }
  func.func @transform_7(%arg0: i32) -> (i32, i32) {
    %c0_i32 = arith.constant 0 : i32
    %c0_i32_0 = arith.constant 0 : i32
    %c0_i32_1 = arith.constant 0 : i32
    return %c0_i32, %c0_i32_0 : i32, i32
  }
  func.func @transform_8(%arg0: i32) -> (i32, i32) {
    %c0_i32 = arith.constant 0 : i32
    %c0_i32_0 = arith.constant 0 : i32
    %c0_i32_1 = arith.constant 0 : i32
    return %c0_i32, %c0_i32_0 : i32, i32
  }
  func.func @transform_9(%arg0: i32) -> (i32, i32) {
    %c0_i32 = arith.constant 0 : i32
    %c0_i32_0 = arith.constant 0 : i32
    return %arg0, %c0_i32 : i32, i32
  }
}

</mosaic_0001>

<bundles_post_ra>
// kernel: tpu_custom_call.1
= control target key start
LH: loop header
LB: loop body
LE: loop exit
PB: predicated region body
PF: predicated region fallthrough
CT: control target
= control target key end

     0   :  { %14 = vsyncpa [#allocation3], 0  ;;  %s809_s0 = inlined_call_operand.hbm [shape: f32[8,16], index: 0, kind: input, shape index: {}]   ;;  %s810_s1 = inlined_call_operand.hbm [shape: bf16[16,128], index: 1, kind: input, shape index: {}]   ;;  %s811_s2 = inlined_call_operand.vmem [shape: f32[1,128], index: 2, kind: input, shape index: {}]   ;;  %s812_s3 = inlined_call_operand.hbm [shape: bf16[128,128], index: 3, kind: input, shape index: {}]   ;;  %s813_s4 = inlined_call_operand.vmem [shape: f32[1,128], index: 4, kind: input, shape index: {}]   ;;  %s814_s5 = inlined_call_operand.hbm [shape: bf16[128,128], index: 5, kind: input, shape index: {}]   ;;  %s815_s6 = inlined_call_operand.vmem [shape: f32[1,128], index: 6, kind: input, shape index: {}]   ;;  %s816_s7 = inlined_call_operand.vmem [shape: f32[1,128], index: 7, kind: input, shape index: {}]   ;;  %s817_s8 = inlined_call_operand.vmem [shape: f32[1,128], index: 8, kind: input, shape index: {}]   ;;  %s818_s9 = inlined_call_operand.hbm [shape: f32[8,128], index: 9, kind: output, shape index: {}]  }
   0x1   :  { %15 = vsyncpa [#allocation6], 0 }
   0x2   :  { %16 = vsyncpa [#allocation9], 0 }
   0x3   :  { %17 = vsyncpa [#allocation4], 0  ;;  %s646_s30 = smov [#allocation5]   ;;  %s528_s13 = scalar_lea.hbm %s810_s1, 128 }
   0x4   :  { %s33_s10 = sshll.u32 %s646_s30, 4  ;;  %p529_p0 = scmp.ne.s32.totalorder %s810_s1, %s528_s13  ;;  %s34_s10 = int_to_ptr.vmem [resolvable:$true] %s33_s10 }
   0x5   :  { %p532_p1 = scmp.lt.u32.totalorder %s528_s13, %s810_s1 }
   0x7   :  { %p534_p2 = pnand %p532_p1, %p529_p0 }
   0x9   :  { %537 = shalt.err (!%p534_p2)
}
   0xa   :  { %s538_s18 = scalar_lea.vmem %s34_s10, 128  ;;  %p543_p4 = scmp.lt.s32.totalorder %s34_s10, %s34_s10 }
   0xb   :  { %p539_p3 = scmp.ne.s32.totalorder %s34_s10, %s538_s18  ;;  %p544_p5 = scmp.lt.s32.totalorder %s538_s18, %s538_s18 }
   0xd   :  { %p545_p6 = por %p544_p5, %p543_p4 }
   0xf   :  { %p546_p7 = pnand %p545_p6, %p539_p3 }
  0x11   :  { %549 = shalt.err (!%p546_p7)
}
  0x12   :  { %s647_s19 = smov 64   ;;  %s648_s20 = smov 4  }
  0x13   :  { %39 = dma.hbm_to_vmem [thread:$0]  %s810_s1, 128, %s34_s10, [#allocation6], %s647_s19, %s647_s19, %s648_s20  }
  0x14   :  { %s649_s23 = smov [#allocation2]   ;;  %s650_s25 = smov [#allocation7]  }
  0x15   :  { %s24_s24 = sshll.u32 %s649_s23, 4  ;;  %s47_s26 = sshll.u32 %s650_s25, 4  ;;  %s25_s24 = int_to_ptr.vmem [resolvable:$true] %s24_s24  ;;  %s48_s26 = int_to_ptr.vmem [resolvable:$true] %s47_s26 }
  0x16   :  { %s550_s29 = scalar_lea.hbm %s809_s0, 128 }
  0x17   :  { %p551_p8 = scmp.ne.s32.totalorder %s809_s0, %s550_s29  ;;  %p554_p9 = scmp.lt.u32.totalorder %s550_s29, %s809_s0 }
  0x19   :  { %p556_p10 = pnand %p554_p9, %p551_p8 }
  0x1b   :  { %559 = shalt.err (!%p556_p10)
}
  0x1c   :  { %s560_s1 = scalar_lea.vmem %s25_s24, 128  ;;  %p565_p12 = scmp.lt.s32.totalorder %s25_s24, %s25_s24 }
  0x1d   :  { %p561_p11 = scmp.ne.s32.totalorder %s25_s24, %s560_s1  ;;  %p566_p13 = scmp.lt.s32.totalorder %s560_s1, %s560_s1 }
  0x1f   :  { %p567_p0 = por %p566_p13, %p565_p12 }
  0x21   :  { %p568_p1 = pnand %p567_p0, %p561_p11 }
  0x23   :  { %571 = shalt.err (!%p568_p1)
}
  0x24   :  { %27 = dma.hbm_to_vmem [thread:$0]  %s809_s0, 128, %s25_s24, [#allocation3]  }
  0x25   :  { %s572_s17 = scalar_lea.hbm %s812_s3, 1024 }
  0x26   :  { %p573_p2 = scmp.ne.s32.totalorder %s812_s3, %s572_s17  ;;  %p576_p3 = scmp.lt.u32.totalorder %s572_s17, %s812_s3 }
  0x28   :  { %p578_p4 = pnand %p576_p3, %p573_p2 }
  0x2a   :  { %581 = shalt.err (!%p578_p4)
}
  0x2b   :  { %s582_s25 = scalar_lea.vmem %s48_s26, 1024  ;;  %p587_p6 = scmp.lt.s32.totalorder %s48_s26, %s48_s26 }
  0x2c   :  { %p583_p5 = scmp.ne.s32.totalorder %s48_s26, %s582_s25  ;;  %p588_p7 = scmp.lt.s32.totalorder %s582_s25, %s582_s25 }
  0x2e   :  { %p589_p8 = por %p588_p7, %p587_p6 }
  0x30   :  { %p590_p9 = pnand %p589_p8, %p583_p5 }
  0x32   :  { %593 = shalt.err (!%p590_p9)
}
  0x33   :  { %53 = dma.hbm_to_vmem [thread:$0]  %s812_s3, 1024, %s48_s26, [#allocation6], %s647_s19, %s647_s19, %s648_s20  }
  0x34   :  { %s651_s27 = smov [#allocation8]   ;;  %s594_s11 = scalar_lea.hbm %s814_s5, 1024 }
  0x35   :  { %s61_s28 = sshll.u32 %s651_s27, 4  ;;  %p595_p10 = scmp.ne.s32.totalorder %s814_s5, %s594_s11  ;;  %s62_s28 = int_to_ptr.vmem [resolvable:$true] %s61_s28 }
  0x36   :  { %p598_p11 = scmp.lt.u32.totalorder %s594_s11, %s814_s5 }
  0x38   :  { %p600_p12 = pnand %p598_p11, %p595_p10 }
  0x3a   :  { %603 = shalt.err (!%p600_p12)
}
  0x3b   :  { %s604_s14 = scalar_lea.vmem %s62_s28, 1024  ;;  %p609_p0 = scmp.lt.s32.totalorder %s62_s28, %s62_s28 }
  0x3c   :  { %p605_p13 = scmp.ne.s32.totalorder %s62_s28, %s604_s14  ;;  %p610_p1 = scmp.lt.s32.totalorder %s604_s14, %s604_s14 }
  0x3e   :  { %p611_p2 = por %p610_p1, %p609_p0 }
  0x40   :  { %p612_p3 = pnand %p611_p2, %p605_p13 }
  0x42   :  { %615 = shalt.err (!%p612_p3)
}
  0x43   :  { %67 = dma.hbm_to_vmem [thread:$0]  %s814_s5, 1024, %s62_s28, [#allocation9], %s647_s19, %s647_s19, %s648_s20  }
  0x44   :  { %638 = dma.done.wait [#allocation3], 128  }
  0x45   :  { %639 = vsyncadd [#allocation3], 4294967168 }
  0x46   :  { %640 = dma.done.wait [#allocation6], 1152  }
  0x47   :  { %641 = vsyncadd [#allocation6], 4294966144 }
  0x48   :  { %642 = dma.done.wait [#allocation9], 1024  }
  0x49   :  { %643 = vsyncadd [#allocation9], 4294966272  ;;  %v652_v0 = vmov 0.0   ;;  %vm653_vm0 = vmmov 0   ;;  %v511_v1 = vld [vmem:[#allocation5] sm:$0xff]   ;;  %v89_v2 = vld [vmem:[#allocation2] sm:$0xff] }
  0x4a   :  { %456 = vmatprep.subr.bf16.mxu0 %v652_v0  ;;  %458 = vmatprep.mubr.msk.bf16.mxu0 %vm653_vm0, %v652_v0  ;;  %v93_v3 = vpack.c.bf16 %v89_v2, %v89_v2  ;;  %vm106_vm1 = vcmask 130048   ;;  %v512_v4 = vld [vmem:[#allocation7] sm:$0xff]   ;;  %v513_v5 = vld [vmem:[#allocation7 + $0x8] sm:$0xff]   ;;  %v514_v6 = vld [vmem:[#allocation7 + $0x10] sm:$0xff]  }
  0x4b   :  { %462 = vmatprep.subr.bf16.mxu1 %v652_v0  ;;  %478 = vmatprep.mubr.msk.bf16.mxu1 %vm653_vm0, %v652_v0  ;;  %v515_v7 = vld [vmem:[#allocation7 + $0x18] sm:$0xff]   ;;  %v516_v8 = vld [vmem:[#allocation7 + $0x20] sm:$0xff]   ;;  %v517_v9 = vld [vmem:[#allocation7 + $0x28] sm:$0xff]  }
  0x4c   :  { %457 = vmatpush3.bf16.msra.mxu0 %v511_v1  ;;  %463 = vmatpush3.bf16.msra.mxu1 %v512_v4  ;;  %v518_v10 = vld [vmem:[#allocation7 + $0x30] sm:$0xff]   ;;  %v519_v11 = vld [vmem:[#allocation7 + $0x38] sm:$0xff]   ;;  %v520_v12 = vld [vmem:[#allocation8] sm:$0xff]  }
  0x4d   :  { %482 = vmatprep.subr.bf16.mxu0 %v652_v0  ;;  %464 = vmatprep.subr.bf16.mxu1 %v652_v0  ;;  %v521_v13 = vld [vmem:[#allocation8 + $0x8] sm:$0xff]   ;;  %v522_v14 = vld [vmem:[#allocation8 + $0x10] sm:$0xff]   ;;  %v523_v15 = vld [vmem:[#allocation8 + $0x18] sm:$0xff]  }
  0x4e   :  { %v524_v16 = vld [vmem:[#allocation8 + $0x20] sm:$0xff]   ;;  %v525_v17 = vld [vmem:[#allocation8 + $0x28] sm:$0xff]   ;;  %v413_v18 = vld [vmem:[%s811_s2] ss:$0 sm:$0xff] }
  0x4f   :  { %459 = vmatmul.mubr.msk.bf16.vlgmr.msra.gmra.mrb[0].mxu0 %vm106_vm1, %v93_v3  ;;  %v416_v19 = vld [vmem:[%s816_s7] ss:$0 sm:$0xff]  ;;  %v527_v29 = vld [vmem:[#allocation8 + $0x38] sm:$0xff]  }
  0x50   :  { %498 = vmatprep.mubr.msk.bf16.mxu0 %vm653_vm0, %v652_v0  ;;  %465 = vmatpush3.bf16.msra.mxu1 %v513_v5  ;;  %v526_v28 = vld [vmem:[#allocation8 + $0x30] sm:$0xff]  }
  0x51   :  { %466 = vmatprep.subr.bf16.mxu1 %v652_v0  ;;  %483 = vmatpush3.bf16.msra.mxu0 %v520_v12  ;;  %v417_v30 = vld [vmem:[%s813_s4] ss:$0 sm:$0xff]  ;;  %s654_s4 = smov [#allocation10]  }
  0x52   :  { %484 = vmatprep.subr.bf16.mxu0 %v652_v0  ;;  %v426_v39 = vld [vmem:[%s815_s6] ss:$0 sm:$0xff]  ;;  %s402_s22 = sshll.u32 %s654_s4, 4  ;;  %s403_s22 = int_to_ptr.vmem [resolvable:$true] %s402_s22 }
  0x53   :  { %v435_v40 = vld [vmem:[%s817_s8] ss:$0 sm:$0xff]  ;;  %s616_s23 = scalar_lea.vmem %s403_s22, 128  ;;  %p621_p5 = scmp.lt.s32.totalorder %s403_s22, %s403_s22 }
  0x54   :  { %467 = vmatpush3.bf16.msra.mxu1 %v514_v6  ;;  %p617_p4 = scmp.ne.s32.totalorder %s403_s22, %s616_s23  ;;  %p622_p6 = scmp.lt.s32.totalorder %s616_s23, %s616_s23 }
  0x55   :  { %468 = vmatprep.subr.bf16.mxu1 %v652_v0  ;;  %485 = vmatpush3.bf16.msra.mxu0 %v521_v13 }
  0x56   :  { %486 = vmatprep.subr.bf16.mxu0 %v652_v0  ;;  %p623_p7 = por %p622_p6, %p621_p5 }
  0x58   :  { %469 = vmatpush3.bf16.msra.mxu1 %v515_v7  ;;  %p624_p8 = pnand %p623_p7, %p617_p4 }
  0x59   :  { %470 = vmatprep.subr.bf16.mxu1 %v652_v0  ;;  %487 = vmatpush3.bf16.msra.mxu0 %v522_v14 }
  0x5a   :  { %488 = vmatprep.subr.bf16.mxu0 %v652_v0 }
  0x5c   :  { %471 = vmatpush3.bf16.msra.mxu1 %v516_v8 }
  0x5d   :  { %472 = vmatprep.subr.bf16.mxu1 %v652_v0  ;;  %489 = vmatpush3.bf16.msra.mxu0 %v523_v15 }
  0x5e   :  { %490 = vmatprep.subr.bf16.mxu0 %v652_v0 }
  0x60   :  { %473 = vmatpush3.bf16.msra.mxu1 %v517_v9 }
  0x61   :  { %474 = vmatprep.subr.bf16.mxu1 %v652_v0  ;;  %491 = vmatpush3.bf16.msra.mxu0 %v524_v16 }
  0x62   :  { %492 = vmatprep.subr.bf16.mxu0 %v652_v0 }
  0x64   :  { %475 = vmatpush3.bf16.msra.mxu1 %v518_v10 }
  0x65   :  { %476 = vmatprep.subr.bf16.mxu1 %v652_v0  ;;  %493 = vmatpush3.bf16.msra.mxu0 %v525_v17 }
  0x66   :  { %494 = vmatprep.subr.bf16.mxu0 %v652_v0 }
  0x68   :  { %477 = vmatpush3.bf16.msra.mxu1 %v519_v11 }
  0x69   :  { %495 = vmatpush3.bf16.msra.mxu0 %v526_v28 }
  0x6a   :  { %496 = vmatprep.subr.bf16.mxu0 %v652_v0 }
  0x6d   :  { %497 = vmatpush3.bf16.msra.mxu0 %v527_v29 }
 0x122   :  { %v144_v20 = vpop.f32.mrb[0].mxu0 }
 0x123   :  { %v145_v21 = vadd.f32 %v413_v18, %v144_v20  ;;  %v460_v22 = vpop.f32.mrb[1].mxu0 }
 0x124   :  { %v147_v23 = vpop.f32.mrb[2].mxu0 }
 0x125   :  { %vm150_vm2 = vcmp.gt.f32.partialorder %v145_v21, 0.0  ;;  %v157_v24 = vmul.f32 %v416_v19, %v145_v21  ;;  %v461_v25 = vpop.f32.mrb[3].mxu0 }
 0x127   :  { %v158_v26 = vsel %vm150_vm2, %v145_v21, %v157_v24 }
 0x128   :  { %v176_v27 = vpack.c.bf16 %v158_v26, %v158_v26 }
 0x12a   :  { %479 = vmatmul.mubr.bf16.vlgmr.msra.gmra.mrb[0].mxu1 %v176_v27 }
 0x1fd   :  { %v265_v31 = vpop.f32.mrb[0].mxu1 }
 0x1fe   :  { %v266_v32 = vadd.f32 %v417_v30, %v265_v31  ;;  %v480_v33 = vpop.f32.mrb[1].mxu1 }
 0x1ff   :  { %v268_v34 = vpop.f32.mrb[2].mxu1 }
 0x200   :  { %vm271_vm3 = vcmp.gt.f32.partialorder %v266_v32, 0.0  ;;  %v272_v35 = vmul.f32 %v416_v19, %v266_v32  ;;  %v481_v36 = vpop.f32.mrb[3].mxu1 }
 0x202   :  { %v273_v37 = vsel %vm271_vm3, %v266_v32, %v272_v35 }
 0x203   :  { %v291_v38 = vpack.c.bf16 %v273_v37, %v273_v37 }
 0x205   :  { %499 = vmatmul.mubr.bf16.vlgmr.msra.gmra.mrb[4].mxu0 %v291_v38 }
 0x2d8   :  { %v380_v41 = vpop.f32.mrb[4].mxu0 }
 0x2d9   :  { %v381_v42 = vadd.f32 %v426_v39, %v380_v41  ;;  %v500_v43 = vpop.f32.mrb[5].mxu0 }
 0x2da   :  { %v383_v44 = vpop.f32.mrb[6].mxu0 }
 0x2db   :  { %v393_v45 = vmul.f32 %v435_v40, %v381_v42  ;;  %v501_v46 = vpop.f32.mrb[7].mxu0  ;;  %vm386_vm4 = vcmp.gt.f32.partialorder %v381_v42, 0.0 }
 0x2dd   :  { %v394_v47 = vsel %vm386_vm4, %v381_v42, %v393_v45 }
 0x2de   :  { %395 = vst [vmem:[#allocation10] sm:$0xff] %v394_v47 }
 0x2df   :  { %627 = shalt.err (!%p624_p8)
}
 0x2e0   :  { %s628_s25 = scalar_lea.hbm %s818_s9, 128 }
 0x2e1   :  { %p629_p9 = scmp.ne.s32.totalorder %s818_s9, %s628_s25  ;;  %p632_p10 = scmp.lt.u32.totalorder %s628_s25, %s818_s9 }
 0x2e3   :  { %p634_p11 = pnand %p632_p10, %p629_p9 }
 0x2e5   :  { %637 = shalt.err (!%p634_p11)
}
 0x2e6   :  { %405 = dma.vmem_to_hbm [thread:$0]  %s403_s22, 128, %s818_s9, [#allocation4]  }
 0x2e7   :  { %644 = dma.done.wait [#allocation4], 128  }
 0x2e8   :  { %645 = vsyncadd [#allocation4], 4294967168 }
 0x2e9   :  { %409 = vsyncpa [#allocation3], 1 }
 0x2ea   :  { %410 = vsyncpa [#allocation6], 1 }
 0x2eb   :  { %411 = vsyncpa [#allocation9], 1 }
 0x2ec   :  { %412 = vsyncpa [#allocation4], 1 }

// kernel: tpu_custom_call.1
= control target key start
LH: loop header
LB: loop body
LE: loop exit
PB: predicated region body
PF: predicated region fallthrough
CT: control target
= control target key end

     0   :  { %14 = vsyncpa [#allocation3], 0  ;;  %s809_s0 = inlined_call_operand.hbm [shape: f32[8,16], index: 0, kind: input, shape index: {}]   ;;  %s810_s1 = inlined_call_operand.hbm [shape: bf16[16,128], index: 1, kind: input, shape index: {}]   ;;  %s811_s2 = inlined_call_operand.vmem [shape: f32[1,128], index: 2, kind: input, shape index: {}]   ;;  %s812_s3 = inlined_call_operand.hbm [shape: bf16[128,128], index: 3, kind: input, shape index: {}]   ;;  %s813_s4 = inlined_call_operand.vmem [shape: f32[1,128], index: 4, kind: input, shape index: {}]   ;;  %s814_s5 = inlined_call_operand.hbm [shape: bf16[128,128], index: 5, kind: input, shape index: {}]   ;;  %s815_s6 = inlined_call_operand.vmem [shape: f32[1,128], index: 6, kind: input, shape index: {}]   ;;  %s816_s7 = inlined_call_operand.vmem [shape: f32[1,128], index: 7, kind: input, shape index: {}]   ;;  %s817_s8 = inlined_call_operand.vmem [shape: f32[1,128], index: 8, kind: input, shape index: {}]   ;;  %s818_s9 = inlined_call_operand.hbm [shape: f32[8,128], index: 9, kind: output, shape index: {}]  }
   0x1   :  { %15 = vsyncpa [#allocation6], 0 }
   0x2   :  { %16 = vsyncpa [#allocation9], 0 }
   0x3   :  { %17 = vsyncpa [#allocation4], 0  ;;  %s646_s30 = smov [#allocation5]   ;;  %s528_s13 = scalar_lea.hbm %s810_s1, 128 }
   0x4   :  { %s33_s10 = sshll.u32 %s646_s30, 4  ;;  %p529_p0 = scmp.ne.s32.totalorder %s810_s1, %s528_s13  ;;  %s34_s10 = int_to_ptr.vmem [resolvable:$true] %s33_s10 }
   0x5   :  { %p532_p1 = scmp.lt.u32.totalorder %s528_s13, %s810_s1 }
   0x7   :  { %p534_p2 = pnand %p532_p1, %p529_p0 }
   0x9   :  { %537 = shalt.err (!%p534_p2)
}
   0xa   :  { %s538_s18 = scalar_lea.vmem %s34_s10, 128  ;;  %p543_p4 = scmp.lt.s32.totalorder %s34_s10, %s34_s10 }
   0xb   :  { %p539_p3 = scmp.ne.s32.totalorder %s34_s10, %s538_s18  ;;  %p544_p5 = scmp.lt.s32.totalorder %s538_s18, %s538_s18 }
   0xd   :  { %p545_p6 = por %p544_p5, %p543_p4 }
   0xf   :  { %p546_p7 = pnand %p545_p6, %p539_p3 }
  0x11   :  { %549 = shalt.err (!%p546_p7)
}
  0x12   :  { %s647_s19 = smov 64   ;;  %s648_s20 = smov 4  }
  0x13   :  { %39 = dma.hbm_to_vmem [thread:$0]  %s810_s1, 128, %s34_s10, [#allocation6], %s647_s19, %s647_s19, %s648_s20  }
  0x14   :  { %s649_s23 = smov [#allocation2]   ;;  %s650_s25 = smov [#allocation7]  }
  0x15   :  { %s24_s24 = sshll.u32 %s649_s23, 4  ;;  %s47_s26 = sshll.u32 %s650_s25, 4  ;;  %s25_s24 = int_to_ptr.vmem [resolvable:$true] %s24_s24  ;;  %s48_s26 = int_to_ptr.vmem [resolvable:$true] %s47_s26 }
  0x16   :  { %s550_s29 = scalar_lea.hbm %s809_s0, 128 }
  0x17   :  { %p551_p8 = scmp.ne.s32.totalorder %s809_s0, %s550_s29  ;;  %p554_p9 = scmp.lt.u32.totalorder %s550_s29, %s809_s0 }
  0x19   :  { %p556_p10 = pnand %p554_p9, %p551_p8 }
  0x1b   :  { %559 = shalt.err (!%p556_p10)
}
  0x1c   :  { %s560_s1 = scalar_lea.vmem %s25_s24, 128  ;;  %p565_p12 = scmp.lt.s32.totalorder %s25_s24, %s25_s24 }
  0x1d   :  { %p561_p11 = scmp.ne.s32.totalorder %s25_s24, %s560_s1  ;;  %p566_p13 = scmp.lt.s32.totalorder %s560_s1, %s560_s1 }
  0x1f   :  { %p567_p0 = por %p566_p13, %p565_p12 }
  0x21   :  { %p568_p1 = pnand %p567_p0, %p561_p11 }
  0x23   :  { %571 = shalt.err (!%p568_p1)
}
  0x24   :  { %27 = dma.hbm_to_vmem [thread:$0]  %s809_s0, 128, %s25_s24, [#allocation3]  }
  0x25   :  { %s572_s17 = scalar_lea.hbm %s812_s3, 1024 }
  0x26   :  { %p573_p2 = scmp.ne.s32.totalorder %s812_s3, %s572_s17  ;;  %p576_p3 = scmp.lt.u32.totalorder %s572_s17, %s812_s3 }
  0x28   :  { %p578_p4 = pnand %p576_p3, %p573_p2 }
  0x2a   :  { %581 = shalt.err (!%p578_p4)
}
  0x2b   :  { %s582_s25 = scalar_lea.vmem %s48_s26, 1024  ;;  %p587_p6 = scmp.lt.s32.totalorder %s48_s26, %s48_s26 }
  0x2c   :  { %p583_p5 = scmp.ne.s32.totalorder %s48_s26, %s582_s25  ;;  %p588_p7 = scmp.lt.s32.totalorder %s582_s25, %s582_s25 }
  0x2e   :  { %p589_p8 = por %p588_p7, %p587_p6 }
  0x30   :  { %p590_p9 = pnand %p589_p8, %p583_p5 }
  0x32   :  { %593 = shalt.err (!%p590_p9)
}
  0x33   :  { %53 = dma.hbm_to_vmem [thread:$0]  %s812_s3, 1024, %s48_s26, [#allocation6], %s647_s19, %s647_s19, %s648_s20  }
  0x34   :  { %s651_s27 = smov [#allocation8]   ;;  %s594_s11 = scalar_lea.hbm %s814_s5, 1024 }
  0x35   :  { %s61_s28 = sshll.u32 %s651_s27, 4  ;;  %p595_p10 = scmp.ne.s32.totalorder %s814_s5, %s594_s11  ;;  %s62_s28 = int_to_ptr.vmem [resolvable:$true] %s61_s28 }
  0x36   :  { %p598_p11 = scmp.lt.u32.totalorder %s594_s11, %s814_s5 }
  0x38   :  { %p600_p12 = pnand %p598_p11, %p595_p10 }
  0x3a   :  { %603 = shalt.err (!%p600_p12)
}
  0x3b   :  { %s604_s14 = scalar_lea.vmem %s62_s28, 1024  ;;  %p609_p0 = scmp.lt.s32.totalorder %s62_s28, %s62_s28 }
  0x3c   :  { %p605_p13 = scmp.ne.s32.totalorder %s62_s28, %s604_s14  ;;  %p610_p1 = scmp.lt.s32.totalorder %s604_s14, %s604_s14 }
  0x3e   :  { %p611_p2 = por %p610_p1, %p609_p0 }
  0x40   :  { %p612_p3 = pnand %p611_p2, %p605_p13 }
  0x42   :  { %615 = shalt.err (!%p612_p3)
}
  0x43   :  { %67 = dma.hbm_to_vmem [thread:$0]  %s814_s5, 1024, %s62_s28, [#allocation9], %s647_s19, %s647_s19, %s648_s20  }
  0x44   :  { %638 = dma.done.wait [#allocation3], 128  }
  0x45   :  { %639 = vsyncadd [#allocation3], 4294967168 }
  0x46   :  { %640 = dma.done.wait [#allocation6], 1152  }
  0x47   :  { %641 = vsyncadd [#allocation6], 4294966144 }
  0x48   :  { %642 = dma.done.wait [#allocation9], 1024  }
  0x49   :  { %643 = vsyncadd [#allocation9], 4294966272  ;;  %v652_v0 = vmov 0.0   ;;  %vm653_vm0 = vmmov 0   ;;  %v511_v1 = vld [vmem:[#allocation5] sm:$0xff]   ;;  %v89_v2 = vld [vmem:[#allocation2] sm:$0xff] }
  0x4a   :  { %456 = vmatprep.subr.bf16.mxu0 %v652_v0  ;;  %458 = vmatprep.mubr.msk.bf16.mxu0 %vm653_vm0, %v652_v0  ;;  %v93_v3 = vpack.c.bf16 %v89_v2, %v89_v2  ;;  %vm106_vm1 = vcmask 130048   ;;  %v512_v4 = vld [vmem:[#allocation7] sm:$0xff]   ;;  %v513_v5 = vld [vmem:[#allocation7 + $0x8] sm:$0xff]   ;;  %v514_v6 = vld [vmem:[#allocation7 + $0x10] sm:$0xff]  }
  0x4b   :  { %462 = vmatprep.subr.bf16.mxu1 %v652_v0  ;;  %478 = vmatprep.mubr.msk.bf16.mxu1 %vm653_vm0, %v652_v0  ;;  %v515_v7 = vld [vmem:[#allocation7 + $0x18] sm:$0xff]   ;;  %v516_v8 = vld [vmem:[#allocation7 + $0x20] sm:$0xff]   ;;  %v517_v9 = vld [vmem:[#allocation7 + $0x28] sm:$0xff]  }
  0x4c   :  { %457 = vmatpush3.bf16.msra.mxu0 %v511_v1  ;;  %463 = vmatpush3.bf16.msra.mxu1 %v512_v4  ;;  %v518_v10 = vld [vmem:[#allocation7 + $0x30] sm:$0xff]   ;;  %v519_v11 = vld [vmem:[#allocation7 + $0x38] sm:$0xff]   ;;  %v520_v12 = vld [vmem:[#allocation8] sm:$0xff]  }
  0x4d   :  { %482 = vmatprep.subr.bf16.mxu0 %v652_v0  ;;  %464 = vmatprep.subr.bf16.mxu1 %v652_v0  ;;  %v521_v13 = vld [vmem:[#allocation8 + $0x8] sm:$0xff]   ;;  %v522_v14 = vld [vmem:[#allocation8 + $0x10] sm:$0xff]   ;;  %v523_v15 = vld [vmem:[#allocation8 + $0x18] sm:$0xff]  }
  0x4e   :  { %v524_v16 = vld [vmem:[#allocation8 + $0x20] sm:$0xff]   ;;  %v525_v17 = vld [vmem:[#allocation8 + $0x28] sm:$0xff]   ;;  %v413_v18 = vld [vmem:[%s811_s2] ss:$0 sm:$0xff] }
  0x4f   :  { %459 = vmatmul.mubr.msk.bf16.vlgmr.msra.gmra.mrb[0].mxu0 %vm106_vm1, %v93_v3  ;;  %v416_v19 = vld [vmem:[%s816_s7] ss:$0 sm:$0xff]  ;;  %v527_v29 = vld [vmem:[#allocation8 + $0x38] sm:$0xff]  }
  0x50   :  { %498 = vmatprep.mubr.msk.bf16.mxu0 %vm653_vm0, %v652_v0  ;;  %465 = vmatpush3.bf16.msra.mxu1 %v513_v5  ;;  %v526_v28 = vld [vmem:[#allocation8 + $0x30] sm:$0xff]  }
  0x51   :  { %466 = vmatprep.subr.bf16.mxu1 %v652_v0  ;;  %483 = vmatpush3.bf16.msra.mxu0 %v520_v12  ;;  %v417_v30 = vld [vmem:[%s813_s4] ss:$0 sm:$0xff]  ;;  %s654_s4 = smov [#allocation10]  }
  0x52   :  { %484 = vmatprep.subr.bf16.mxu0 %v652_v0  ;;  %v426_v39 = vld [vmem:[%s815_s6] ss:$0 sm:$0xff]  ;;  %s402_s22 = sshll.u32 %s654_s4, 4  ;;  %s403_s22 = int_to_ptr.vmem [resolvable:$true] %s402_s22 }
  0x53   :  { %v435_v40 = vld [vmem:[%s817_s8] ss:$0 sm:$0xff]  ;;  %s616_s23 = scalar_lea.vmem %s403_s22, 128  ;;  %p621_p5 = scmp.lt.s32.totalorder %s403_s22, %s403_s22 }
  0x54   :  { %467 = vmatpush3.bf16.msra.mxu1 %v514_v6  ;;  %p617_p4 = scmp.ne.s32.totalorder %s403_s22, %s616_s23  ;;  %p622_p6 = scmp.lt.s32.totalorder %s616_s23, %s616_s23 }
  0x55   :  { %468 = vmatprep.subr.bf16.mxu1 %v652_v0  ;;  %485 = vmatpush3.bf16.msra.mxu0 %v521_v13 }
  0x56   :  { %486 = vmatprep.subr.bf16.mxu0 %v652_v0  ;;  %p623_p7 = por %p622_p6, %p621_p5 }
  0x58   :  { %469 = vmatpush3.bf16.msra.mxu1 %v515_v7  ;;  %p624_p8 = pnand %p623_p7, %p617_p4 }
  0x59   :  { %470 = vmatprep.subr.bf16.mxu1 %v652_v0  ;;  %487 = vmatpush3.bf16.msra.mxu0 %v522_v14 }
  0x5a   :  { %488 = vmatprep.subr.bf16.mxu0 %v652_v0 }
  0x5c   :  { %471 = vmatpush3.bf16.msra.mxu1 %v516_v8 }
  0x5d   :  { %472 = vmatprep.subr.bf16.mxu1 %v652_v0  ;;  %489 = vmatpush3.bf16.msra.mxu0 %v523_v15 }
  0x5e   :  { %490 = vmatprep.subr.bf16.mxu0 %v652_v0 }
  0x60   :  { %473 = vmatpush3.bf16.msra.mxu1 %v517_v9 }
  0x61   :  { %474 = vmatprep.subr.bf16.mxu1 %v652_v0  ;;  %491 = vmatpush3.bf16.msra.mxu0 %v524_v16 }
  0x62   :  { %492 = vmatprep.subr.bf16.mxu0 %v652_v0 }
  0x64   :  { %475 = vmatpush3.bf16.msra.mxu1 %v518_v10 }
  0x65   :  { %476 = vmatprep.subr.bf16.mxu1 %v652_v0  ;;  %493 = vmatpush3.bf16.msra.mxu0 %v525_v17 }
  0x66   :  { %494 = vmatprep.subr.bf16.mxu0 %v652_v0 }
  0x68   :  { %477 = vmatpush3.bf16.msra.mxu1 %v519_v11 }
  0x69   :  { %495 = vmatpush3.bf16.msra.mxu0 %v526_v28 }
  0x6a   :  { %496 = vmatprep.subr.bf16.mxu0 %v652_v0 }
  0x6d   :  { %497 = vmatpush3.bf16.msra.mxu0 %v527_v29 }
 0x122   :  { %v144_v20 = vpop.f32.mrb[0].mxu0 }
 0x123   :  { %v145_v21 = vadd.f32 %v413_v18, %v144_v20  ;;  %v460_v22 = vpop.f32.mrb[1].mxu0 }
 0x124   :  { %v147_v23 = vpop.f32.mrb[2].mxu0 }
 0x125   :  { %vm150_vm2 = vcmp.gt.f32.partialorder %v145_v21, 0.0  ;;  %v157_v24 = vmul.f32 %v416_v19, %v145_v21  ;;  %v461_v25 = vpop.f32.mrb[3].mxu0 }
 0x127   :  { %v158_v26 = vsel %vm150_vm2, %v145_v21, %v157_v24 }
 0x128   :  { %v176_v27 = vpack.c.bf16 %v158_v26, %v158_v26 }
 0x12a   :  { %479 = vmatmul.mubr.bf16.vlgmr.msra.gmra.mrb[0].mxu1 %v176_v27 }
 0x1fd   :  { %v265_v31 = vpop.f32.mrb[0].mxu1 }
 0x1fe   :  { %v266_v32 = vadd.f32 %v417_v30, %v265_v31  ;;  %v480_v33 = vpop.f32.mrb[1].mxu1 }
 0x1ff   :  { %v268_v34 = vpop.f32.mrb[2].mxu1 }
 0x200   :  { %vm271_vm3 = vcmp.gt.f32.partialorder %v266_v32, 0.0  ;;  %v272_v35 = vmul.f32 %v416_v19, %v266_v32  ;;  %v481_v36 = vpop.f32.mrb[3].mxu1 }
 0x202   :  { %v273_v37 = vsel %vm271_vm3, %v266_v32, %v272_v35 }
 0x203   :  { %v291_v38 = vpack.c.bf16 %v273_v37, %v273_v37 }
 0x205   :  { %499 = vmatmul.mubr.bf16.vlgmr.msra.gmra.mrb[4].mxu0 %v291_v38 }
 0x2d8   :  { %v380_v41 = vpop.f32.mrb[4].mxu0 }
 0x2d9   :  { %v381_v42 = vadd.f32 %v426_v39, %v380_v41  ;;  %v500_v43 = vpop.f32.mrb[5].mxu0 }
 0x2da   :  { %v383_v44 = vpop.f32.mrb[6].mxu0 }
 0x2db   :  { %v393_v45 = vmul.f32 %v435_v40, %v381_v42  ;;  %v501_v46 = vpop.f32.mrb[7].mxu0  ;;  %vm386_vm4 = vcmp.gt.f32.partialorder %v381_v42, 0.0 }
 0x2dd   :  { %v394_v47 = vsel %vm386_vm4, %v381_v42, %v393_v45 }
 0x2de   :  { %395 = vst [vmem:[#allocation10] sm:$0xff] %v394_v47 }
 0x2df   :  { %627 = shalt.err (!%p624_p8)
}
 0x2e0   :  { %s628_s25 = scalar_lea.hbm %s818_s9, 128 }
 0x2e1   :  { %p629_p9 = scmp.ne.s32.totalorder %s818_s9, %s628_s25  ;;  %p632_p10 = scmp.lt.u32.totalorder %s628_s25, %s818_s9 }
 0x2e3   :  { %p634_p11 = pnand %p632_p10, %p629_p9 }
 0x2e5   :  { %637 = shalt.err (!%p634_p11)
}
 0x2e6   :  { %405 = dma.vmem_to_hbm [thread:$0]  %s403_s22, 128, %s818_s9, [#allocation4]  }
 0x2e7   :  { %644 = dma.done.wait [#allocation4], 128  }
 0x2e8   :  { %645 = vsyncadd [#allocation4], 4294967168 }
 0x2e9   :  { %409 = vsyncpa [#allocation3], 1 }
 0x2ea   :  { %410 = vsyncpa [#allocation6], 1 }
 0x2eb   :  { %411 = vsyncpa [#allocation9], 1 }
 0x2ec   :  { %412 = vsyncpa [#allocation4], 1 }

</bundles_post_ra>
